<compile_context>
chip_gen: v7x
topology: tpu7x:2x2x1
jax: 0.10.0
libtpu: 0.0.40
codegen_flags: <defaults>
</compile_context>

<pallas_src>
import jax
import jax.numpy as jnp
from jax.experimental import pallas as pl
from jax.experimental.pallas import tpu as pltpu

LANE = 128
SUBLANE = 8
MAX_BLOCK_ROWS = 8192  # 8192 x 128 f32 = 4 MiB / block / input


def _round_up(x, m):
    return -(-x // m) * m


def _min_sublane(dtype):
    # Minimum legal second-minor tile for this dtype (f32: 8, bf16: 16, i8: 32).
    return max(SUBLANE, 32 // jnp.dtype(dtype).itemsize)


def _num_tensorcores():
    """Best-effort TensorCores-per-chip (2 on v7x, 1 on v5e/v6e)."""
    try:
        info = pltpu.get_tpu_info()
        for attr in ("num_cores", "core_count", "cores_per_chip",
                     "num_tensorcores", "tensorcore_count"):
            v = getattr(info, attr, None)
            if isinstance(v, int) and 1 <= v <= 8:
                return v
    except Exception:
        pass
    try:
        kind = jax.devices()[0].device_kind.lower()
        if "v7" in kind:
            return 2
    except Exception:
        pass
    return 1


def _make_dice_kernel(rows, block_rows, blocks_per_shard, full_blocks, needs_mask):
    """Kernel closure.  All geometry arguments are static Python ints."""

    def kernel(x_ref, t_ref, inter_out, isum_out, tsum_out,
               inter_acc, isum_acc, tsum_acc):
        k = pl.program_id(1)  # reduction axis (innermost, arbitrary)

        @pl.when(k == 0)
        def _():
            inter_acc[...] = jnp.zeros_like(inter_acc)
            isum_acc[...] = jnp.zeros_like(isum_acc)
            tsum_acc[...] = jnp.zeros_like(tsum_acc)

        x = x_ref[...].astype(jnp.float32)
        t = t_ref[...].astype(jnp.float32)
        # Single-EUP-op sigmoid (tanh form); numerically stable for finite x.
        p = 0.5 * (jnp.tanh(0.5 * x) + 1.0)

        def accumulate(p_blk, t_blk):
            # Sublane-axis partial sums: (block_rows, 128) -> (bk/8, 8, 128)
            # -> (8, 128).  Tile-aligned reshape + cross-vreg VPU adds.
            inter_acc[...] += jnp.sum(
                (p_blk * t_blk).reshape(-1, SUBLANE, LANE), axis=0)
            isum_acc[...] += jnp.sum(p_blk.reshape(-1, SUBLANE, LANE), axis=0)
            tsum_acc[...] += jnp.sum(t_blk.reshape(-1, SUBLANE, LANE), axis=0)

        if not needs_mask:
            accumulate(p, t)
        else:
            s = pl.program_id(0)
            logical_block = s * blocks_per_shard + k

            # Fast path: block lies entirely inside the valid row range.
            @pl.when(logical_block < full_blocks)
            def _():
                accumulate(p, t)

            # Slow path (at most one partial block + clamp-duplicated blocks):
            # zero out rows past `rows` before accumulating.  p and t are both
            # masked before the multiply, so boundary-pad garbage never leaks.
            @pl.when(logical_block >= full_blocks)
            def _():
                row0 = logical_block * block_rows
                row_ids = row0 + jax.lax.broadcasted_iota(
                    jnp.int32, (block_rows, LANE), 0)
                valid = row_ids < rows
                accumulate(jnp.where(valid, p, 0.0), jnp.where(valid, t, 0.0))

        @pl.when(k == pl.num_programs(1) - 1)
        def _():
            inter_out[0] = inter_acc[...]
            isum_out[0] = isum_acc[...]
            tsum_out[0] = tsum_acc[...]

    return kernel


def dice_loss(inputs, targets, smooth=1.0):
    """Pallas TPU implementation of the PyTorch DiceLoss.forward."""
    assert inputs.shape == targets.shape
    n = int(inputs.size)
    smooth = jnp.float32(smooth)

    x = inputs.reshape(-1)
    t = targets.reshape(-1)
    if t.dtype == jnp.bool_:
        # Pallas-friendly narrow int; the f32 cast happens inside the kernel.
        t = t.astype(jnp.int8)

    rows = n // LANE
    n_main = rows * LANE
    tail = n - n_main

    # <=127-element tail handled with plain jnp in the epilogue (no host-side
    # pad of the full arrays).
    tail_inter = tail_isum = tail_tsum = jnp.float32(0.0)
    if tail:
        xt = jax.lax.slice(x, (n_main,), (n,)).astype(jnp.float32)
        tt = jax.lax.slice(t, (n_main,), (n,)).astype(jnp.float32)
        pt = jax.nn.sigmoid(xt)
        tail_inter = jnp.sum(pt * tt)
        tail_isum = jnp.sum(pt)
        tail_tsum = jnp.sum(tt)

    if rows == 0:
        # Entire input is smaller than one lane row; nothing for the kernel.
        denom = tail_isum + tail_tsum + smooth
        return 1.0 - (2.0 * tail_inter + smooth) / denom

    x_main = x if tail == 0 else jax.lax.slice(x, (0,), (n_main,))
    t_main = t if tail == 0 else jax.lax.slice(t, (0,), (n_main,))
    x2 = x_main.reshape(rows, LANE)   # free bitcast for contiguous data
    t2 = t_main.reshape(rows, LANE)

    # Block / grid geometry (all static Python ints).
    row_align = max(_min_sublane(x2.dtype), _min_sublane(t2.dtype))
    block_rows = min(MAX_BLOCK_ROWS, _round_up(rows, row_align))
    total_blocks = -(-rows // block_rows)

    num_tc = _num_tensorcores()
    num_shards = 2 if (num_tc >= 2 and total_blocks >= 2) else 1
    blocks_per_shard = -(-total_blocks // num_shards)
    full_blocks = rows // block_rows
    needs_mask = (num_shards * blocks_per_shard * block_rows) != rows

    def in_map(s, k):
        # Clamp so the DMA never walks past the array; out-of-range logical
        # blocks (ragged last shard) are fully masked inside the kernel.
        return (jnp.minimum(s * blocks_per_shard + k, total_blocks - 1), 0)

    out_map = lambda s, k: (s, 0, 0)
    partial_shape = jax.ShapeDtypeStruct((num_shards, SUBLANE, LANE), jnp.float32)
    partial_spec = pl.BlockSpec((1, SUBLANE, LANE), out_map)

    if num_shards == 2:
        dim_sem = (pltpu.CORE_PARALLEL, pltpu.ARBITRARY)   # genuine 2-TC split
    else:
        dim_sem = (pltpu.ARBITRARY, pltpu.ARBITRARY)

    # Double-buffered inputs must fit scoped VMEM on every generation.
    block_bytes = block_rows * LANE * (x2.dtype.itemsize + t2.dtype.itemsize)
    vmem_limit = max(2 * block_bytes + (4 << 20), 32 << 20)

    inter_p, isum_p, tsum_p = pl.pallas_call(
        _make_dice_kernel(rows, block_rows, blocks_per_shard, full_blocks,
                          needs_mask),
        out_shape=(partial_shape, partial_shape, partial_shape),
        grid_spec=pltpu.PrefetchScalarGridSpec(
            num_scalar_prefetch=0,
            grid=(num_shards, blocks_per_shard),
            in_specs=[
                pl.BlockSpec((block_rows, LANE), in_map),
                pl.BlockSpec((block_rows, LANE), in_map),
            ],
            out_specs=(partial_spec, partial_spec, partial_spec),
            scratch_shapes=[
                pltpu.VMEM((SUBLANE, LANE), jnp.float32),
                pltpu.VMEM((SUBLANE, LANE), jnp.float32),
                pltpu.VMEM((SUBLANE, LANE), jnp.float32),
            ],
        ),
        compiler_params=pltpu.CompilerParams(
            dimension_semantics=dim_sem,
            vmem_limit_bytes=int(vmem_limit),
        ),
    )(x2, t2)

    # Tiny epilogue: reduce (num_shards, 8, 128) partials, add the tail, and
    # apply the dice formula.
    intersection = jnp.sum(inter_p) + tail_inter
    denom = jnp.sum(isum_p) + jnp.sum(tsum_p) + tail_isum + tail_tsum + smooth
    return 1.0 - (2.0 * intersection + smooth) / denom


def dice_loss_ref(inputs, targets, smooth=1.0):
    p = jax.nn.sigmoid(inputs.astype(jnp.float32)).reshape(-1)
    t = targets.astype(jnp.float32).reshape(-1)
    inter = jnp.sum(p * t)
    return 1.0 - (2.0 * inter + smooth) / (jnp.sum(p) + jnp.sum(t) + smooth)


if __name__ == "__main__":
    key = jax.random.PRNGKey(0)
    k1, k2 = jax.random.split(key)

    # NCHW logits and binary targets (B=2, C=4, H=W=16).
    inputs = jax.random.normal(k1, (2, 4, 16, 16), dtype=jnp.float32)
    targets = (jax.random.uniform(k2, (2, 4, 16, 16)) > 0.5).astype(jnp.float32)

    dice_fn = jax.jit(dice_loss)
    loss = dice_fn(inputs, targets, 1.0)
    loss = jax.block_until_ready(loss)

    ref = dice_loss_ref(inputs, targets, 1.0)
    assert jnp.allclose(loss, ref, atol=1e-5, rtol=1e-5), (loss, ref)

    print("KERNEL_OK")
</pallas_src>

<mosaic_0001>
module attributes {stable_mosaic.version = 11 : i64} {
  func.func @kernel(%arg0: i32, %arg1: i32, %arg2: memref<16x128xf32, #tpu.memory_space<vmem>>, %arg3: memref<16x128xf32, #tpu.memory_space<vmem>>, %arg4: memref<1x8x128xf32, #tpu.memory_space<vmem>>, %arg5: memref<1x8x128xf32, #tpu.memory_space<vmem>>, %arg6: memref<1x8x128xf32, #tpu.memory_space<vmem>>, %arg7: memref<8x128xf32, #tpu.memory_space<vmem>>, %arg8: memref<8x128xf32, #tpu.memory_space<vmem>>, %arg9: memref<8x128xf32, #tpu.memory_space<vmem>>) attributes {dimension_semantics = [#tpu.dimension_semantics<arbitrary>, #tpu.dimension_semantics<arbitrary>], iteration_bounds = array<i64: 1, 1>, scalar_prefetch = 0 : i64, scratch_operands = 3 : i64, tpu.core_type = #tpu.core_type<tc>, window_params = [{transform_indices = @transform_0, window_bounds = array<i64: 16, 128>}, {transform_indices = @transform_1, window_bounds = array<i64: 16, 128>}, {transform_indices = @transform_2, window_bounds = array<i64: 1, 8, 128>}, {transform_indices = @transform_3, window_bounds = array<i64: 1, 8, 128>}, {transform_indices = @transform_4, window_bounds = array<i64: 1, 8, 128>}]} {
    %c0_i32 = arith.constant 0 : i32
    %0 = arith.cmpi eq, %arg1, %c0_i32 : i32
    %1 = arith.extui %0 : i1 to i32
    %c0_i32_0 = arith.constant 0 : i32
    %2 = arith.cmpi ne, %1, %c0_i32_0 : i32
    scf.if %2 {
      %cst_23 = arith.constant 0.000000e+00 : f32
      %31 = vector.broadcast %cst_23 : f32 to vector<8x128xf32>
      %c0_24 = arith.constant 0 : index
      %c0_25 = arith.constant 0 : index
      %32 = vector.load %arg7[%c0_24, %c0_25] : memref<8x128xf32, #tpu.memory_space<vmem>>, vector<8x128xf32>
      tpu.vector_store %arg7[%c0_24, %c0_25], %31 {strides = array<i32>} : memref<8x128xf32, #tpu.memory_space<vmem>>, vector<8x128xf32>,
      %cst_26 = arith.constant 0.000000e+00 : f32
      %33 = vector.broadcast %cst_26 : f32 to vector<8x128xf32>
      %c0_27 = arith.constant 0 : index
      %c0_28 = arith.constant 0 : index
      %34 = vector.load %arg8[%c0_27, %c0_28] : memref<8x128xf32, #tpu.memory_space<vmem>>, vector<8x128xf32>
      tpu.vector_store %arg8[%c0_27, %c0_28], %33 {strides = array<i32>} : memref<8x128xf32, #tpu.memory_space<vmem>>, vector<8x128xf32>,
      %cst_29 = arith.constant 0.000000e+00 : f32
      %35 = vector.broadcast %cst_29 : f32 to vector<8x128xf32>
      %c0_30 = arith.constant 0 : index
      %c0_31 = arith.constant 0 : index
      %36 = vector.load %arg9[%c0_30, %c0_31] : memref<8x128xf32, #tpu.memory_space<vmem>>, vector<8x128xf32>
      tpu.vector_store %arg9[%c0_30, %c0_31], %35 {strides = array<i32>} : memref<8x128xf32, #tpu.memory_space<vmem>>, vector<8x128xf32>,
    } else {
    }
    %c0 = arith.constant 0 : index
    %c0_1 = arith.constant 0 : index
    %3 = vector.load %arg2[%c0, %c0_1] : memref<16x128xf32, #tpu.memory_space<vmem>>, vector<16x128xf32>
    %c0_2 = arith.constant 0 : index
    %c0_3 = arith.constant 0 : index
    %4 = vector.load %arg3[%c0_2, %c0_3] : memref<16x128xf32, #tpu.memory_space<vmem>>, vector<16x128xf32>
    %cst = arith.constant 5.000000e-01 : f32
    %5 = vector.broadcast %cst : f32 to vector<16x128xf32>
    %6 = arith.mulf %5, %3 : vector<16x128xf32>
    %7 = math.tanh %6 : vector<16x128xf32>
    %cst_4 = arith.constant 1.000000e+00 : f32
    %8 = vector.broadcast %cst_4 : f32 to vector<16x128xf32>
    %9 = arith.addf %7, %8 : vector<16x128xf32>
    %cst_5 = arith.constant 5.000000e-01 : f32
    %10 = vector.broadcast %cst_5 : f32 to vector<16x128xf32>
    %11 = arith.mulf %10, %9 : vector<16x128xf32>
    %c0_6 = arith.constant 0 : index
    %c0_7 = arith.constant 0 : index
    %12 = vector.load %arg7[%c0_6, %c0_7] : memref<8x128xf32, #tpu.memory_space<vmem>>, vector<8x128xf32>
    %13 = arith.mulf %11, %4 : vector<16x128xf32>
    %14 = vector.shape_cast %13 : vector<16x128xf32> to vector<2x8x128xf32>
    %cst_8 = arith.constant dense<0.000000e+00> : vector<8x128xf32>
    %15 = vector.multi_reduction <add>, %14, %cst_8 [0] : vector<2x8x128xf32> to vector<8x128xf32>
    %16 = arith.addf %12, %15 : vector<8x128xf32>
    %c0_9 = arith.constant 0 : index
    %c0_10 = arith.constant 0 : index
    %17 = vector.load %arg7[%c0_9, %c0_10] : memref<8x128xf32, #tpu.memory_space<vmem>>, vector<8x128xf32>
    tpu.vector_store %arg7[%c0_9, %c0_10], %16 {strides = array<i32>} : memref<8x128xf32, #tpu.memory_space<vmem>>, vector<8x128xf32>,
    %c0_11 = arith.constant 0 : index
    %c0_12 = arith.constant 0 : index
    %18 = vector.load %arg8[%c0_11, %c0_12] : memref<8x128xf32, #tpu.memory_space<vmem>>, vector<8x128xf32>
    %19 = vector.shape_cast %11 : vector<16x128xf32> to vector<2x8x128xf32>
    %cst_13 = arith.constant dense<0.000000e+00> : vector<8x128xf32>
    %20 = vector.multi_reduction <add>, %19, %cst_13 [0] : vector<2x8x128xf32> to vector<8x128xf32>
    %21 = arith.addf %18, %20 : vector<8x128xf32>
    %c0_14 = arith.constant 0 : index
    %c0_15 = arith.constant 0 : index
    %22 = vector.load %arg8[%c0_14, %c0_15] : memref<8x128xf32, #tpu.memory_space<vmem>>, vector<8x128xf32>
    tpu.vector_store %arg8[%c0_14, %c0_15], %21 {strides = array<i32>} : memref<8x128xf32, #tpu.memory_space<vmem>>, vector<8x128xf32>,
    %c0_16 = arith.constant 0 : index
    %c0_17 = arith.constant 0 : index
    %23 = vector.load %arg9[%c0_16, %c0_17] : memref<8x128xf32, #tpu.memory_space<vmem>>, vector<8x128xf32>
    %24 = vector.shape_cast %4 : vector<16x128xf32> to vector<2x8x128xf32>
    %cst_18 = arith.constant dense<0.000000e+00> : vector<8x128xf32>
    %25 = vector.multi_reduction <add>, %24, %cst_18 [0] : vector<2x8x128xf32> to vector<8x128xf32>
    %26 = arith.addf %23, %25 : vector<8x128xf32>
    %c0_19 = arith.constant 0 : index
    %c0_20 = arith.constant 0 : index
    %27 = vector.load %arg9[%c0_19, %c0_20] : memref<8x128xf32, #tpu.memory_space<vmem>>, vector<8x128xf32>
    tpu.vector_store %arg9[%c0_19, %c0_20], %26 {strides = array<i32>} : memref<8x128xf32, #tpu.memory_space<vmem>>, vector<8x128xf32>,
    %c0_i32_21 = arith.constant 0 : i32
    %28 = arith.cmpi eq, %arg1, %c0_i32_21 : i32
    %29 = arith.extui %28 : i1 to i32
    %c0_i32_22 = arith.constant 0 : i32
    %30 = arith.cmpi ne, %29, %c0_i32_22 : i32
    scf.if %30 {
      %c0_23 = arith.constant 0 : index
      %c0_24 = arith.constant 0 : index
      %31 = vector.load %arg7[%c0_23, %c0_24] : memref<8x128xf32, #tpu.memory_space<vmem>>, vector<8x128xf32>
      %c0_25 = arith.constant 0 : index
      %c0_26 = arith.constant 0 : index
      %c0_27 = arith.constant 0 : index
      %32 = vector.load %arg4[%c0_25, %c0_26, %c0_27] : memref<1x8x128xf32, #tpu.memory_space<vmem>>, vector<1x8x128xf32>
      %33 = vector.shape_cast %32 : vector<1x8x128xf32> to vector<8x128xf32>
      %34 = vector.shape_cast %31 : vector<8x128xf32> to vector<1x8x128xf32>
      tpu.vector_store %arg4[%c0_25, %c0_26, %c0_27], %34 {strides = array<i32>} : memref<1x8x128xf32, #tpu.memory_space<vmem>>, vector<1x8x128xf32>,
      %c0_28 = arith.constant 0 : index
      %c0_29 = arith.constant 0 : index
      %35 = vector.load %arg8[%c0_28, %c0_29] : memref<8x128xf32, #tpu.memory_space<vmem>>, vector<8x128xf32>
      %c0_30 = arith.constant 0 : index
      %c0_31 = arith.constant 0 : index
      %c0_32 = arith.constant 0 : index
      %36 = vector.load %arg5[%c0_30, %c0_31, %c0_32] : memref<1x8x128xf32, #tpu.memory_space<vmem>>, vector<1x8x128xf32>
      %37 = vector.shape_cast %36 : vector<1x8x128xf32> to vector<8x128xf32>
      %38 = vector.shape_cast %35 : vector<8x128xf32> to vector<1x8x128xf32>
      tpu.vector_store %arg5[%c0_30, %c0_31, %c0_32], %38 {strides = array<i32>} : memref<1x8x128xf32, #tpu.memory_space<vmem>>, vector<1x8x128xf32>,
      %c0_33 = arith.constant 0 : index
      %c0_34 = arith.constant 0 : index
      %39 = vector.load %arg9[%c0_33, %c0_34] : memref<8x128xf32, #tpu.memory_space<vmem>>, vector<8x128xf32>
      %c0_35 = arith.constant 0 : index
      %c0_36 = arith.constant 0 : index
      %c0_37 = arith.constant 0 : index
      %40 = vector.load %arg6[%c0_35, %c0_36, %c0_37] : memref<1x8x128xf32, #tpu.memory_space<vmem>>, vector<1x8x128xf32>
      %41 = vector.shape_cast %40 : vector<1x8x128xf32> to vector<8x128xf32>
      %42 = vector.shape_cast %39 : vector<8x128xf32> to vector<1x8x128xf32>
      tpu.vector_store %arg6[%c0_35, %c0_36, %c0_37], %42 {strides = array<i32>} : memref<1x8x128xf32, #tpu.memory_space<vmem>>, vector<1x8x128xf32>,
    } else {
    }
    return
  }
  func.func @transform_0(%arg0: i32, %arg1: i32) -> (i32, i32) {
    %c1_i32 = arith.constant 1 : i32
    %0 = arith.muli %arg0, %c1_i32 : i32
    %1 = arith.addi %0, %arg1 : i32
    %c0_i32 = arith.constant 0 : i32
    %2 = arith.minsi %1, %c0_i32 : i32
    %c0_i32_0 = arith.constant 0 : i32
    %c0_i32_1 = arith.constant 0 : i32
    return %2, %c0_i32_0 : i32, i32
  }
  func.func @transform_1(%arg0: i32, %arg1: i32) -> (i32, i32) {
    %c1_i32 = arith.constant 1 : i32
    %0 = arith.muli %arg0, %c1_i32 : i32
    %1 = arith.addi %0, %arg1 : i32
    %c0_i32 = arith.constant 0 : i32
    %2 = arith.minsi %1, %c0_i32 : i32
    %c0_i32_0 = arith.constant 0 : i32
    %c0_i32_1 = arith.constant 0 : i32
    return %2, %c0_i32_0 : i32, i32
  }
  func.func @transform_2(%arg0: i32, %arg1: i32) -> (i32, i32, i32) {
    %c0_i32 = arith.constant 0 : i32
    %c0_i32_0 = arith.constant 0 : i32
    %c0_i32_1 = arith.constant 0 : i32
    return %arg0, %c0_i32, %c0_i32_0 : i32, i32, i32
  }
  func.func @transform_3(%arg0: i32, %arg1: i32) -> (i32, i32, i32) {
    %c0_i32 = arith.constant 0 : i32
    %c0_i32_0 = arith.constant 0 : i32
    %c0_i32_1 = arith.constant 0 : i32
    return %arg0, %c0_i32, %c0_i32_0 : i32, i32, i32
  }
  func.func @transform_4(%arg0: i32, %arg1: i32) -> (i32, i32, i32) {
    %c0_i32 = arith.constant 0 : i32
    %c0_i32_0 = arith.constant 0 : i32
    %c0_i32_1 = arith.constant 0 : i32
    return %arg0, %c0_i32, %c0_i32_0 : i32, i32, i32
  }
}

</mosaic_0001>

<bundles_post_ra>
// kernel: dice_loss.1
= control target key start
LH: loop header
LB: loop body
LE: loop exit
PB: predicated region body
PF: predicated region fallthrough
CT: control target
= control target key end

     0   :  { %s194_s0 = inlined_call_operand.vmem [shape: f32[16,128], index: 0, kind: input, shape index: {}]   ;;  %s195_s1 = inlined_call_operand.vmem [shape: f32[16,128], index: 1, kind: input, shape index: {}]   ;;  %s196_s4 = inlined_call_operand.vmem [shape: f32[1,8,128], index: 4, kind: output, shape index: {2}]   ;;  %s197_s3 = inlined_call_operand.vmem [shape: f32[1,8,128], index: 3, kind: output, shape index: {1}]   ;;  %s198_s2 = inlined_call_operand.vmem [shape: f32[1,8,128], index: 2, kind: output, shape index: {0}]  }
   0x1   :  { %v85_v0 = vld [vmem:[%s194_s0] sm:$0xff]  ;;  %v86_v1 = vld [vmem:[%s194_s0 + $0x8] sm:$0xff] }
   0x2   :  { %v87_v2 = vld [vmem:[%s195_s1] sm:$0xff]  ;;  %v88_v3 = vld [vmem:[%s195_s1 + $0x8] sm:$0xff]  ;;  %v89_v4 = vmul.f32 0.5, %v85_v0  ;;  %v90_v5 = vmul.f32 0.5, %v86_v1 }
   0x3   :  { %v108_v6 = vadd.f32 %v88_v3, %v87_v2 }
   0x4   :  { %144 = vtanh.f32 %v89_v4 }
   0x5   :  { %146 = vtanh.f32 %v90_v5  ;;  %119 = vst [vmem:[%s196_s4] sm:$0xff] %v108_v6 }
   0xe   :  { %v145_v7 = vpop.eup %144 }
   0xf   :  { %v147_v8 = vpop.eup %146  ;;  %v93_v9 = vadd.f32 1.0, %v145_v7 }
  0x10   :  { %v94_v10 = vadd.f32 1.0, %v147_v8 }
  0x11   :  { %v95_v11 = vmul.f32 0.5, %v93_v9 }
  0x12   :  { %v96_v12 = vmul.f32 0.5, %v94_v10 }
  0x13   :  { %v98_v13 = vmul.f32 %v95_v11, %v87_v2 }
  0x14   :  { %v99_v14 = vmul.f32 %v96_v12, %v88_v3  ;;  %v104_v15 = vadd.f32 %v96_v12, %v95_v11 }
  0x16   :  { %v100_v16 = vadd.f32 %v99_v14, %v98_v13  ;;  %117 = vst [vmem:[%s197_s3] sm:$0xff] %v104_v15 }
  0x18   :  { %115 = vst [vmem:[%s198_s2] sm:$0xff] %v100_v16 }

</bundles_post_ra>
